<compile_context>
chip_gen: v6e
topology: v6e:2x2x1
jax: 0.10.0
libtpu: 0.0.40
codegen_flags: <defaults>
</compile_context>

<pallas_src>
import functools

import jax
import jax.numpy as jnp
from jax import lax
from jax.experimental import pallas as pl
from jax.experimental.pallas import tpu as pltpu


def _round_up(x, m):
    return ((x + m - 1) // m) * m


def _vmem_capacity_bytes():
    """Generation-aware VMEM capacity; conservative 64 MiB (v7x) fallback."""
    try:
        info = pltpu.get_tpu_info()
        cap = getattr(info, "vmem_capacity_bytes", None)
        if cap:
            return int(cap)
    except Exception:
        pass
    return 64 * 1024 * 1024


def _pointer_kernel(dec_ref, enc_ref, bias_ref, out_ref, acc_ref, *,
                    num_k, mask_pad, compute_dtype):
    """One (batch, q-tile, k-tile) step: partial scores; softmax on last k."""
    k = pl.program_id(2)

    dec = dec_ref[0]            # (tq, D)
    enc = enc_ref[0]            # (tk, D)
    # In-kernel cast: DMA the caller's dtype, cast on the VPU right before the
    # MXU (avoids a separate wrapper-side astype pass over HBM).
    if compute_dtype is not None and dec.dtype != compute_dtype:
        dec = dec.astype(compute_dtype)
        enc = enc.astype(compute_dtype)

    # Contract trailing feature dims directly (no enc.T / XLU transpose).
    s = lax.dot_general(
        dec, enc,
        dimension_numbers=(((1,), (1,)), ((), ())),
        preferred_element_type=jnp.float32)          # (tq, tk), f32 accum

    # Lane-padding mask as a single additive bias (0 / -1e30). Static skip
    # when Sk is already a multiple of the k tile.
    if mask_pad:
        s = s + bias_ref[0]                          # (1, tk) broadcast

    if num_k == 1:
        # Whole row of scores is in registers: single-pass softmax.
        m = jnp.max(s, axis=-1, keepdims=True)
        e = jnp.exp(s - m)
        denom = jnp.sum(e, axis=-1, keepdims=True)
        out_ref[0] = (e * pl.reciprocal(denom, approx=False)).astype(out_ref.dtype)
    else:
        # Stash this k tile's scores; finalize once all k tiles are present.
        acc_ref[k] = s                               # (num_k, tq, tk) scratch

        @pl.when(k == num_k - 1)
        def _finish():
            scores = acc_ref[...]                    # (num_k, tq, tk)
            m = jnp.max(scores, axis=0, keepdims=True)
            m = jnp.max(m, axis=-1, keepdims=True)   # (1, tq, 1)
            e = jnp.exp(scores - m)
            denom = jnp.sum(e, axis=0, keepdims=True)
            denom = jnp.sum(denom, axis=-1, keepdims=True)
            p = e * pl.reciprocal(denom, approx=False)
            tk = scores.shape[-1]
            for j in range(num_k):                   # static, lane-dense stores
                out_ref[0, :, j * tk:(j + 1) * tk] = p[j].astype(out_ref.dtype)


def pointer_generator(decoder_output, encoder_output, *, block_q=256,
                      block_k=None, compute_dtype=jnp.bfloat16,
                      out_dtype=jnp.float32):
    """attention_probs = softmax(dec @ enc^T, axis=-1), fused on TPU.

    compute_dtype=jnp.bfloat16 (default) rounds dec/enc to bf16 for the MXU
    (f32 accumulation + f32 softmax); pass jnp.float32 for the exact path.
    """
    B, Sq, D = decoder_output.shape
    B2, Sk, D2 = encoder_output.shape
    assert B == B2 and D == D2, "decoder/encoder batch or feature mismatch"

    in_b = jnp.dtype(decoder_output.dtype).itemsize
    out_b = jnp.dtype(out_dtype).itemsize

    # Balanced q tiling (multiple of 8 sublanes, minimal padding).
    n_q = max(1, pl.cdiv(Sq, block_q))
    tq = _round_up(pl.cdiv(Sq, n_q), 8)
    sq_p = _round_up(Sq, tq)

    cap = _vmem_capacity_bytes()
    budget = int(cap * 0.75)

    def footprint(tq_, tk_, sk_p_, nk_):
        f = 2 * tq_ * D * in_b          # dec tile (double-buffered)
        f += 2 * tk_ * D * in_b         # enc tile (double-buffered)
        f += 2 * tq_ * sk_p_ * out_b    # resident output block
        f += 2 * tk_ * 4                # bias (negligible)
        if nk_ > 1:
            f += nk_ * tq_ * tk_ * 4    # f32 score scratch (= tq * sk_p)
        return f

    # Pick the k tile: keep enc fully resident when it fits the budget,
    # otherwise tile Sk (bounds enc residency, critical on v7x's 64 MiB).
    sk_full = _round_up(Sk, 128)
    cands = [sk_full] + [c for c in (2048, 1024, 512, 256, 128) if c < sk_full]
    if block_k is not None:
        bk = max(128, _round_up(block_k, 128))
        cands = [c for c in cands if c <= bk] or [128]
    tk = cands[-1]
    sk_p = _round_up(Sk, tk)
    num_k = sk_p // tk
    for c in cands:
        sk_c = _round_up(Sk, c)
        nk_c = sk_c // c
        if footprint(tq, c, sk_c, nk_c) <= budget:
            tk, sk_p, num_k = c, sk_c, nk_c
            break
    while footprint(tq, tk, sk_p, num_k) > budget and tq > 8:
        tq = _round_up(max(8, tq // 2), 8)
    sq_p = _round_up(Sq, tq)
    n_q = sq_p // tq

    dec = decoder_output
    enc = encoder_output
    if sq_p != Sq:
        dec = jnp.pad(dec, ((0, 0), (0, sq_p - Sq), (0, 0)))
    if sk_p != Sk:
        enc = jnp.pad(enc, ((0, 0), (0, sk_p - Sk), (0, 0)))

    mask_pad = sk_p != Sk
    col = lax.broadcasted_iota(jnp.int32, (sk_p,), 0)
    bias = jnp.where(col < Sk, 0.0, -1e30).astype(jnp.float32)
    bias = bias.reshape(num_k, 1, tk)                    # per-k-tile bias

    acc_shape = (num_k, tq, tk) if num_k > 1 else (1, 8, 128)

    kernel = functools.partial(_pointer_kernel, num_k=num_k,
                               mask_pad=mask_pad, compute_dtype=compute_dtype)

    fp = footprint(tq, tk, sk_p, num_k)
    vmem_limit = int(min(cap, max(32 * 1024 * 1024, fp + (16 << 20))))

    cost = pl.CostEstimate(
        flops=2 * B * sq_p * sk_p * D,
        transcendentals=B * sq_p * sk_p,
        bytes_accessed=int(B * sq_p * D * in_b
                           + B * n_q * sk_p * D * in_b
                           + B * sq_p * sk_p * out_b))

    out = pl.pallas_call(
        kernel,
        out_shape=jax.ShapeDtypeStruct((B, sq_p, sk_p), out_dtype),
        grid_spec=pltpu.PrefetchScalarGridSpec(
            num_scalar_prefetch=0,
            grid=(B, n_q, num_k),
            in_specs=[
                pl.BlockSpec((1, tq, D), lambda b, i, k: (b, i, 0)),   # dec
                pl.BlockSpec((1, tk, D), lambda b, i, k: (b, k, 0)),   # enc
                pl.BlockSpec((1, 1, tk), lambda b, i, k: (k, 0, 0)),   # bias
            ],
            out_specs=pl.BlockSpec((1, tq, sk_p), lambda b, i, k: (b, i, 0)),
            scratch_shapes=[pltpu.VMEM(acc_shape, jnp.float32)],
        ),
        compiler_params=pltpu.CompilerParams(
            dimension_semantics=("parallel", "parallel", "arbitrary"),
            vmem_limit_bytes=vmem_limit),
        cost_estimate=cost,
    )(dec, enc, bias)

    if sq_p != Sq or sk_p != Sk:
        out = out[:, :Sq, :Sk]
    return out


def _reference(decoder_output, encoder_output):
    """Pure-JAX reference mirroring the PyTorch forward."""
    scores = jnp.einsum("bqd,bkd->bqk", decoder_output, encoder_output)
    return jax.nn.softmax(scores, axis=-1)


if __name__ == "__main__":
    B, Sq, Sk, D = 2, 8, 8, 32
    rng = jax.random.PRNGKey(0)
    k1, k2, k3, k4, k5, k6 = jax.random.split(rng, 6)

    dec = jax.random.normal(k1, (B, Sq, D), jnp.float32)
    enc = jax.random.normal(k2, (B, Sk, D), jnp.float32)
    ref = _reference(dec, enc)

    # Exact f32 path (matches the PyTorch semantics).
    p_f32 = pointer_generator(dec, enc, compute_dtype=jnp.float32)
    jax.block_until_ready(p_f32)
    assert p_f32.shape == (B, Sq, Sk)
    assert jnp.allclose(p_f32, ref, atol=5e-5, rtol=5e-5), "f32 path mismatch"

    # Default bf16-MXU path (f32 accumulation/softmax); compare against the
    # reference evaluated on bf16-rounded inputs, plus row-sum sanity.
    p_bf = pointer_generator(dec, enc)
    jax.block_until_ready(p_bf)
    ref_bf = _reference(dec.astype(jnp.bfloat16).astype(jnp.float32),
                        enc.astype(jnp.bfloat16).astype(jnp.float32))
    assert jnp.allclose(p_bf, ref_bf, atol=1e-3, rtol=1e-3), "bf16 path mismatch"
    assert jnp.allclose(jnp.sum(p_bf, axis=-1), 1.0, atol=1e-3), "rows not normalized"

    # Unaligned Sq/Sk: exercises q/k padding + the additive pad-column mask.
    Sq2, Sk2 = 10, 40
    dec2 = jax.random.normal(k3, (B, Sq2, D), jnp.float32)
    enc2 = jax.random.normal(k4, (B, Sk2, D), jnp.float32)
    ref2 = _reference(dec2, enc2)
    p2 = pointer_generator(dec2, enc2, compute_dtype=jnp.float32)
    jax.block_until_ready(p2)
    assert p2.shape == (B, Sq2, Sk2)
    assert jnp.allclose(p2, ref2, atol=5e-5, rtol=5e-5), "padded-shape mismatch"

    # Forced Sk tiling: exercises the multi-k scratch + pl.when finalize path.
    Sq3, Sk3 = 16, 384
    dec3 = jax.random.normal(k5, (B, Sq3, D), jnp.float32)
    enc3 = jax.random.normal(k6, (B, Sk3, D), jnp.float32)
    ref3 = _reference(dec3, enc3)
    p3 = pointer_generator(dec3, enc3, compute_dtype=jnp.float32, block_k=128)
    jax.block_until_ready(p3)
    assert p3.shape == (B, Sq3, Sk3)
    assert jnp.allclose(p3, ref3, atol=5e-5, rtol=5e-5), "tiled-Sk path mismatch"

    print("KERNEL_OK")
</pallas_src>

<mosaic_0001>
module attributes {stable_mosaic.version = 11 : i64} {
  func.func @_pointer_kernel(%arg0: i32, %arg1: i32, %arg2: i32, %arg3: memref<1x8x32xf32, #tpu.memory_space<vmem>>, %arg4: memref<1x128x32xf32, #tpu.memory_space<vmem>>, %arg5: memref<1x1x128xf32, #tpu.memory_space<vmem>>, %arg6: memref<1x8x128xf32, #tpu.memory_space<vmem>>, %arg7: memref<1x8x128xf32, #tpu.memory_space<vmem>>) attributes {dimension_semantics = [#tpu.dimension_semantics<parallel>, #tpu.dimension_semantics<parallel>, #tpu.dimension_semantics<arbitrary>], iteration_bounds = array<i64: 2, 1, 1>, scalar_prefetch = 0 : i64, scratch_operands = 1 : i64, tpu.core_type = #tpu.core_type<tc>, window_params = [{transform_indices = @transform_0, window_bounds = array<i64: 1, 8, 32>}, {transform_indices = @transform_1, window_bounds = array<i64: 1, 128, 32>}, {transform_indices = @transform_2, window_bounds = array<i64: 1, 1, 128>}, {transform_indices = @transform_3, window_bounds = array<i64: 1, 8, 128>}]} {
    %c0 = arith.constant 0 : index
    %c0_0 = arith.constant 0 : index
    %c0_1 = arith.constant 0 : index
    %0 = vector.load %arg3[%c0, %c0_0, %c0_1] : memref<1x8x32xf32, #tpu.memory_space<vmem>>, vector<1x8x32xf32>
    %1 = vector.shape_cast %0 : vector<1x8x32xf32> to vector<8x32xf32>
    %c0_2 = arith.constant 0 : index
    %c0_3 = arith.constant 0 : index
    %c0_4 = arith.constant 0 : index
    %2 = vector.load %arg4[%c0_2, %c0_3, %c0_4] : memref<1x128x32xf32, #tpu.memory_space<vmem>>, vector<1x128x32xf32>
    %3 = vector.shape_cast %2 : vector<1x128x32xf32> to vector<128x32xf32>
    %cst = arith.constant dense<0.000000e+00> : vector<8x128xf32>
    %4 = tpu.matmul %1, %3, %cst {dimension_numbers = #tpu.dot_dimension_numbers<[1], [1], [0], [0], [0, 0, 1, 0], [], []>} : vector<8x32xf32>, vector<128x32xf32>, vector<8x128xf32> -> vector<8x128xf32>
    %c0_5 = arith.constant 0 : index
    %c0_6 = arith.constant 0 : index
    %c0_7 = arith.constant 0 : index
    %5 = vector.load %arg5[%c0_5, %c0_6, %c0_7] : memref<1x1x128xf32, #tpu.memory_space<vmem>>, vector<1x1x128xf32>
    %6 = vector.shape_cast %5 : vector<1x1x128xf32> to vector<1x128xf32>
    %7 = vector.broadcast %6 : vector<1x128xf32> to vector<8x128xf32>
    %8 = arith.addf %4, %7 : vector<8x128xf32>
    %cst_8 = arith.constant dense<0xFF800000> : vector<8xf32>
    %9 = vector.multi_reduction <maximumf>, %8, %cst_8 [1] : vector<8x128xf32> to vector<8xf32>
    %10 = vector.shape_cast %9 : vector<8xf32> to vector<8x1xf32>
    %11 = vector.broadcast %10 : vector<8x1xf32> to vector<8x128xf32>
    %12 = arith.subf %8, %11 : vector<8x128xf32>
    %13 = math.exp %12 : vector<8x128xf32>
    %cst_9 = arith.constant dense<0.000000e+00> : vector<8xf32>
    %14 = vector.multi_reduction <add>, %13, %cst_9 [1] : vector<8x128xf32> to vector<8xf32>
    %15 = vector.shape_cast %14 : vector<8xf32> to vector<8x1xf32>
    %16 = tpu.reciprocal %15 : vector<8x1xf32> -> vector<8x1xf32>
    %17 = vector.broadcast %16 : vector<8x1xf32> to vector<8x128xf32>
    %18 = arith.mulf %13, %17 : vector<8x128xf32>
    %c0_10 = arith.constant 0 : index
    %c0_11 = arith.constant 0 : index
    %c0_12 = arith.constant 0 : index
    %19 = vector.load %arg6[%c0_10, %c0_11, %c0_12] : memref<1x8x128xf32, #tpu.memory_space<vmem>>, vector<1x8x128xf32>
    %20 = vector.shape_cast %19 : vector<1x8x128xf32> to vector<8x128xf32>
    %21 = vector.shape_cast %18 : vector<8x128xf32> to vector<1x8x128xf32>
    tpu.vector_store %arg6[%c0_10, %c0_11, %c0_12], %21 {strides = array<i32>} : memref<1x8x128xf32, #tpu.memory_space<vmem>>, vector<1x8x128xf32>,
    return
  }
  func.func @transform_0(%arg0: i32, %arg1: i32, %arg2: i32) -> (i32, i32, i32) {
    %c0_i32 = arith.constant 0 : i32
    %c0_i32_0 = arith.constant 0 : i32
    return %arg0, %arg1, %c0_i32 : i32, i32, i32
  }
  func.func @transform_1(%arg0: i32, %arg1: i32, %arg2: i32) -> (i32, i32, i32) {
    %c0_i32 = arith.constant 0 : i32
    %c0_i32_0 = arith.constant 0 : i32
    return %arg0, %arg2, %c0_i32 : i32, i32, i32
  }
  func.func @transform_2(%arg0: i32, %arg1: i32, %arg2: i32) -> (i32, i32, i32) {
    %c0_i32 = arith.constant 0 : i32
    %c0_i32_0 = arith.constant 0 : i32
    %c0_i32_1 = arith.constant 0 : i32
    return %arg2, %c0_i32, %c0_i32_0 : i32, i32, i32
  }
  func.func @transform_3(%arg0: i32, %arg1: i32, %arg2: i32) -> (i32, i32, i32) {
    %c0_i32 = arith.constant 0 : i32
    %c0_i32_0 = arith.constant 0 : i32
    return %arg0, %arg1, %c0_i32 : i32, i32, i32
  }
}

</mosaic_0001>

<bundles_post_ra>
// kernel: tpu_custom_call.1
= control target key start
LH: loop header
LB: loop body
LE: loop exit
PB: predicated region body
PF: predicated region fallthrough
CT: control target
= control target key end

     0   :  { %8 = vsyncpa [#allocation4], 0  ;;  %s914_s0 = inlined_call_operand.vmem [shape: f32[2,8,32], index: 0, kind: input, shape index: {}]   ;;  %s915_s1 = inlined_call_operand.vmem [shape: f32[2,128,32], index: 1, kind: input, shape index: {}]   ;;  %s916_s2 = inlined_call_operand.vmem [shape: f32[1,1,128], index: 2, kind: input, shape index: {}]   ;;  %s917_s3 = inlined_call_operand.hbm [shape: f32[2,8,128], index: 3, kind: output, shape index: {}]  }
   0x1   :  { %10 = vsyncpa [#allocation4 + $0x1], 0  ;;  %s770_s12 = smov 0   ;;  %s772_s13 = smov 0  }
   0x2   :  { %s774_s14 = smov 0   ;;  %s776_s15 = smov 0  }
   0x3   :  { %s778_s16 = smov 0   ;;  %s780_s17 = smov 0  }
   0x4 LB: > { %s523_s18 = sadd.s32 4294967295, %s745_s17   ;;  %s524_s19 = sadd.s32 4294967294, %s745_s17   ;;  %s745_s17 = sphi %s780_s17, %s16_s17   ;;  %s741_s16 = sphi %s778_s16, %s924_s16   ;;  %s737_s15 = sphi %s776_s15, %s923_s15   ;;  %s733_s14 = sphi %s774_s14, %s922_s14   ;;  %s729_s13 = sphi %s772_s13, %s921_s13   ;;  %s725_s12 = sphi %s770_s12, %s920_s12  }
   0x5   : > { %s35_s20 = sadd.s32 1, %s741_s16  ;;  %s126_s21 = sadd.s32 1, %s733_s14 }
   0x6   : > { %p37_p0 = scmp.ge.s32.totalorder %s35_s20, 2  ;;  %p136_p1 = scmp.ne.s32.totalorder %s733_s14, %s729_s13 }
   0x7   : > { %p137_p2 = scmp.eq.s32.totalorder %s523_s18, 1  ;;  %p142_p3 = scmp.ne.s32.totalorder %s729_s13, %s725_s12 }
   0x8   : > { %s926_s20 = smov (%p37_p0, %s35_s20), 0  ;;  %p143_p5 = scmp.eq.s32.totalorder %s524_s19, 1 }
   0x9   : > { %p810_p4 = por %p137_p2, %p136_p1  ;;  %s121_s23 = ssub.s32 %s741_s16, %s926_s20 }
   0xa   : > { %p528_p6 = scmp.ge.s32.totalorder %s745_s17, 1  ;;  %p124_p7 = scmp.eq.s32.totalorder %s121_s23, 0 }
   0xb   : > { %p817_p8 = por %p143_p5, %p142_p3  ;;  %p190_p9 = scmp.lt.s32.totalorder %s745_s17, 3 }
   0xc   : > { %s823_s25 = scalar_select %p124_p7, %s733_s14, %s126_s21  }
   0xd   : > { %p191_p10 = pnand %p528_p6, %p190_p9 }
   0xe   : > { %p228_p11 = scmp.lt.s32.totalorder (!%p191_p10), %s737_s15, 1  ;;  %s225_s10 = sand.u32 (!%p191_p10), 1, %s729_s13  }
   0xf   : > { %194 = sbr.rel (%p191_p10) target bundleno = 606 (0x25e), region = 32  ;;  %s529_s11 = sshll.u32 (!%p191_p10), %s225_s10, 3 }
  0x10   : > { %s552_s18 = sshll.u32 (!%p191_p10), %s737_s15, 7  ;;  %s227_s19 = scalar_lea.vmem (!%p191_p10), [#allocation3], %s529_s11 }
  0x11   : > { %s419_s21 = sshll.u32 (!%p191_p10), %s227_s19, 4  ;;  %s405_s28 = scalar_lea.sflag (!%p191_p10), [#allocation4], %s225_s10  ;;  %s420_s21 = int_to_ptr.vmem [resolvable:$true] %s419_s21 }
  0x12   : > { %s669_s29 = scalar_lea.vmem (!%p191_p10), %s420_s21, 128 }
  0x13   : > { %p670_p12 = scmp.ne.s32.totalorder (!%p191_p10), %s420_s21, %s669_s29 }
  0x14   : > { %v747_v0 = vmov 0.0   ;;  %vm748_vm0 = vmmov 0   ;;  %s827_s26 = scalar_select %p228_p11, %s737_s15, 1  ;;  %vm272_vm1 = vcmask 261120   ;;  %v533_v18 = vld [vmem:[%s916_s2] ss:$0 sm:$0xff] }
  0x15   : > { %573 = vmatprep.subr.mxu0 %v747_v0  ;;  %605 = vmatprep.mubr.msk.f32.mxu0 %vm748_vm0, %v747_v0  ;;  %p671_p13 = pnand %p670_p12, %p810_p4 }
  0x16   : > { %s555_s27 = sshll.u32 %s827_s26, 7  ;;  %s530_s4 = sshll.u32 %s827_s26, 3 }
  0x17   : > { %s833_s30 = scalar_lea.vmem %s915_s1, %s555_s27  ;;  %s234_s7 = scalar_lea.vmem %s914_s0, %s530_s4 }
  0x18   : > { %v264_v1 = vld [vmem:[%s833_s30 + $0x78] sm:$0xff]  ;;  %v263_v2 = vld [vmem:[%s833_s30 + $0x70] sm:$0xff]  ;;  %v262_v3 = vld [vmem:[%s833_s30 + $0x68] sm:$0xff]  ;;  %s417_s27 = scalar_lea.hbm %s917_s3, %s552_s18  ;;  %p672_p0 = pneg %p671_p13 }
  0x19   : > { %574 = vmatpush3.xpose.msk.msra.mxu0 %vm272_vm1, %v264_v1  ;;  %v261_v4 = vld [vmem:[%s833_s30 + $0x60] sm:$0xff]  ;;  %v260_v5 = vld [vmem:[%s833_s30 + $0x58] sm:$0xff]  ;;  %v259_v6 = vld [vmem:[%s833_s30 + $0x50] sm:$0xff] }
  0x1a   : > { %575 = vmatprep.subr.mxu0 %v747_v0  ;;  %v258_v7 = vld [vmem:[%s833_s30 + $0x48] sm:$0xff]  ;;  %v257_v8 = vld [vmem:[%s833_s30 + $0x40] sm:$0xff]  ;;  %v256_v9 = vld [vmem:[%s833_s30 + $0x38] sm:$0xff] }
  0x1b   : > { %v255_v10 = vld [vmem:[%s833_s30 + $0x30] sm:$0xff]  ;;  %v254_v11 = vld [vmem:[%s833_s30 + $0x28] sm:$0xff]  ;;  %v253_v12 = vld [vmem:[%s833_s30 + $0x20] sm:$0xff] }
  0x1c   : > { %v252_v13 = vld [vmem:[%s833_s30 + $0x18] sm:$0xff]  ;;  %v251_v14 = vld [vmem:[%s833_s30 + $0x10] sm:$0xff]  ;;  %v250_v15 = vld [vmem:[%s833_s30 + $0x8] sm:$0xff] }
  0x1d   : > { %576 = vmatpush3.xpose.msk.msra.mxu0 %vm272_vm1, %v263_v2  ;;  %v249_v16 = vld [vmem:[%s833_s30] sm:$0xff]  ;;  %s749_s30 = smov [#allocation3]  }
  0x1e   : > { %577 = vmatprep.subr.mxu0 %v747_v0  ;;  %v248_v17 = vld [vmem:[%s234_s7] sm:$0xff]  ;;  %s673_s4 = sshll.u32 %s749_s30, 4  ;;  %s674_s4 = int_to_ptr.vmem [resolvable:$false] %s673_s4 }
  0x1f   : > { %s675_s15 = scalar_lea.vmem %s674_s4, 256  ;;  %p676_p1 = scmp.lt.s32.totalorder %s420_s21, %s674_s4 }
  0x20   : > { %p677_p2 = scmp.lt.s32.totalorder %s675_s15, %s669_s29 }
  0x21   : > { %578 = vmatpush3.xpose.msk.msra.mxu0 %vm272_vm1, %v262_v3 }
  0x22   : > { %579 = vmatprep.subr.mxu0 %v747_v0  ;;  %p678_p3 = por %p677_p2, %p676_p1 }
  0x24   : > { %p679_p5 = pnand %p678_p3, %p672_p0 }
  0x25   : > { %580 = vmatpush3.xpose.msk.msra.mxu0 %vm272_vm1, %v261_v4 }
  0x26   : > { %581 = vmatprep.subr.mxu0 %v747_v0 }
  0x29   : > { %582 = vmatpush3.xpose.msk.msra.mxu0 %vm272_vm1, %v260_v5 }
  0x2a   : > { %583 = vmatprep.subr.mxu0 %v747_v0 }
  0x2d   : > { %584 = vmatpush3.xpose.msk.msra.mxu0 %vm272_vm1, %v259_v6 }
  0x2e   : > { %585 = vmatprep.subr.mxu0 %v747_v0 }
  0x31   : > { %586 = vmatpush3.xpose.msk.msra.mxu0 %vm272_vm1, %v258_v7 }
  0x32   : > { %587 = vmatprep.subr.mxu0 %v747_v0 }
  0x35   : > { %588 = vmatpush3.xpose.msk.msra.mxu0 %vm272_vm1, %v257_v8 }
  0x36   : > { %589 = vmatprep.subr.mxu0 %v747_v0 }
  0x39   : > { %590 = vmatpush3.xpose.msk.msra.mxu0 %vm272_vm1, %v256_v9 }
  0x3a   : > { %591 = vmatprep.subr.mxu0 %v747_v0 }
  0x3d   : > { %592 = vmatpush3.xpose.msk.msra.mxu0 %vm272_vm1, %v255_v10 }
  0x3e   : > { %593 = vmatprep.subr.mxu0 %v747_v0 }
  0x41   : > { %594 = vmatpush3.xpose.msk.msra.mxu0 %vm272_vm1, %v254_v11 }
  0x42   : > { %595 = vmatprep.subr.mxu0 %v747_v0 }
  0x45   : > { %596 = vmatpush3.xpose.msk.msra.mxu0 %vm272_vm1, %v253_v12 }
  0x46   : > { %597 = vmatprep.subr.mxu0 %v747_v0 }
  0x49   : > { %598 = vmatpush3.xpose.msk.msra.mxu0 %vm272_vm1, %v252_v13 }
  0x4a   : > { %599 = vmatprep.subr.mxu0 %v747_v0 }
  0x4d   : > { %600 = vmatpush3.xpose.msk.msra.mxu0 %vm272_vm1, %v251_v14 }
  0x4e   : > { %601 = vmatprep.subr.mxu0 %v747_v0 }
  0x51   : > { %602 = vmatpush3.xpose.msk.msra.mxu0 %vm272_vm1, %v250_v15 }
  0x52   : > { %603 = vmatprep.subr.mxu0 %v747_v0 }
  0x55   : > { %604 = vmatpush3.xpose.msk.msra.mxu0 %vm272_vm1, %v249_v16 }
  0x58   : > { %606 = vmatmul.mubr.msk.f32.vlgmr.msra.gmra.mxu0 %vm272_vm1, %v248_v17 }
 0x118   : > { %v390_v19 = vpop.f32.mrf.mxu0 }
 0x119   : > { %v391_v20 = vadd.f32 %v533_v18, %v390_v19 }
 0x11a   : > { %v607_v21 = vpop.f32.mrf.mxu0 }
 0x11b   : > { %394 = vmax.xlane.f32.xlu0 %v391_v20 }
 0x1a4   : > { %v395_v22 = vpop.xlane.xlu0 %394 }
 0x1a5   : > { %v396_v23 = vsub.f32 %v391_v20, %v395_v22 }
 0x1a7   : > { %v397_v24 = vmul.f32 1.442695, %v396_v23 }
 0x1a9   : > { %665 = vpow2.f32 %v397_v24 }
 0x1b6   : > { %v666_v25 = vpop.eup %665 }
 0x1b7   : > { %399 = vadd.xlane.f32.xlu0 %v666_v25 }
 0x240   : > { %v400_v26 = vpop.xlane.xlu0 %399 }
 0x241   : > { %667 = vrcp.f32 %v400_v26 }
 0x24e   : > { %v668_v27 = vpop.eup %667 }
 0x24f   : > { %v402_v28 = vmul.f32 %v668_v27, %v666_v25 }
 0x251   : > { %403 = vst [vmem:[%s227_s19] sm:$0xff] %v402_v28 }
 0x252   : > { %682 = shalt.err (!%p679_p5)
}
 0x253   : > { %s683_s5 = scalar_lea.hbm %s417_s27, 128  ;;  %s687_s8 = scalar_lea.hbm %s917_s3, 256 }
 0x254   : > { %p684_p6 = scmp.ne.s32.totalorder %s417_s27, %s683_s5  ;;  %p688_p10 = scmp.lt.s32.totalorder %s417_s27, %s917_s3 }
 0x255   : > { %p689_p11 = scmp.lt.s32.totalorder %s687_s8, %s683_s5 }
 0x256   : > { %p685_p7 = pnand %p684_p6, %p810_p4 }
 0x257   : > { %p690_p12 = por %p689_p11, %p688_p10 }
 0x258   : > { %p686_p9 = pneg %p685_p7 }
 0x25a   : > { %p691_p13 = pnand %p690_p12, %p686_p9 }
 0x25c   : > { %694 = shalt.err (!%p691_p13)
}
 0x25d   : > { %608 = dma.vmem_to_hbm [thread:$0]  (%p810_p4), %s420_s21, 128, %s417_s27, %s405_s28  }
 0x25e PF: > { %p614_p0 = scmp.ge.s32.totalorder %s745_s17, 2  ;;  %s431_s11 = sand.u32 1, %s725_s12  }
 0x25f   : > { %s432_s18 = scalar_lea.sflag [#allocation4], %s431_s11 }
 0x260   : > { %p611_p1 = pnand %p614_p0, %p817_p8 }
 0x262   : > { %p612_p2 = pneg %p611_p1 }
 0x264   : > { %720 = dma.done.wait (%p612_p2), %s432_s18, 128  }
 0x265   : > { %722 = vsyncadd (%p612_p2), %s432_s18, 4294967168  ;;  %s16_s17 = sadd.s32 1, %s745_s17   ;;  %s920_s12 = smov %s729_s13 }
 0x266   : > { %p13_p3 = scmp.ge.s32.totalorder %s16_s17, 4   ;;  %s921_s13 = smov %s733_s14 }
 0x267   : > { %s922_s14 = smov %s823_s25  ;;  %s923_s15 = smov %s741_s16 }
 0x268   : > { %s924_s16 = smov %s926_s20  ;;  %15 = sbr.rel (!%p13_p3) target bundleno = 4 (0x4), region = 73 }
 0x26d   :  { %437 = vsyncpa [#allocation4], 1 }
 0x26e   :  { %439 = vsyncpa [#allocation4 + $0x1], 1 }

</bundles_post_ra>
